<compile_context>
chip_gen: v5e
topology: v5e:2x2
jax: 0.10.0
libtpu: 0.0.40
codegen_flags: <defaults>
</compile_context>

<pallas_src>
import math
import functools

import jax
import jax.numpy as jnp
from jax import lax
from jax.experimental import pallas as pl
from jax.experimental.pallas import tpu as pltpu

OUT_PAD = 128  # lane-dense padded width for the final quantile projection


# ----------------------------- packed-vector layouts --------------------------

def _layout(entries):
    offs, o = {}, 0
    for name, ln in entries:
        offs[name] = (o, ln)
        o += ln
    return offs, o


def _enc_vec_layout(D, H):
    return _layout([('bqkv', 3 * D), ('bo', D), ('b1', H), ('b2', D),
                    ('ln1_g', D), ('ln1_b', D), ('ln2_g', D), ('ln2_b', D)])


def _dec_vec_layout(D, H):
    return _layout([('sa_bqkv', 3 * D), ('sa_bo', D), ('ca_bq', D),
                    ('ca_bkv', 2 * D), ('ca_bo', D), ('b1', H), ('b2', D),
                    ('ln1_g', D), ('ln1_b', D), ('ln2_g', D), ('ln2_b', D),
                    ('ln3_g', D), ('ln3_b', D)])


def _glb_vec_layout(D, out_pad):
    return _layout([('b_src', D), ('w_tgt', D), ('b_tgt', D),
                    ('en_g', D), ('en_b', D), ('dn_g', D), ('dn_b', D),
                    ('b_out', out_pad)])


# --------------------- standalone PositionalEncoding kernel -------------------

def _pe_kernel(x_ref, pe_ref, o_ref):
    o_ref[...] = x_ref[...] + pe_ref[...]


def positional_encoding(x, pe):
    """PositionalEncoding.forward: x + pe[:S]; dropout = eval-mode identity.
    Lane-dense flattened view with a tiled grid (pipelined DMA)."""
    B, S, D = x.shape
    pe_s = pe[:S]
    if (S * D) % 128 == 0:
        R = (S * D) // 128
        tr = R
        for cand in (512, 256, 128, 64, 32, 16, 8):   # biggest row tile dividing R
            if R % cand == 0:
                tr = cand
                break
        xr = x.reshape(B, R, 128)
        per = pe_s.reshape(1, R, 128)
        out = pl.pallas_call(
            _pe_kernel,
            out_shape=jax.ShapeDtypeStruct((B, R, 128), x.dtype),
            grid=(B, R // tr),
            in_specs=[pl.BlockSpec((1, tr, 128), lambda b, r: (b, r, 0)),
                      pl.BlockSpec((1, tr, 128), lambda b, r: (0, r, 0))],
            out_specs=pl.BlockSpec((1, tr, 128), lambda b, r: (b, r, 0)),
            compiler_params=pltpu.CompilerParams(
                dimension_semantics=("parallel", "parallel")),
        )(xr, per)
        return out.reshape(B, S, D)
    # fallback: single full-array block (small / irregular shapes)
    return pl.pallas_call(
        _pe_kernel,
        out_shape=jax.ShapeDtypeStruct((B, S, D), x.dtype),
    )(x, pe_s[None])


# --------------------------- fused transformer kernel -------------------------

def _fused_transformer_kernel(src_ref, tgt_ref, pe_src_ref, pe_tgt_ref,
                              w_src, e_wqkv, e_wo, e_w1, e_w2, e_vec,
                              d_sa_wqkv, d_sa_wo, d_ca_wq, d_ca_wkv, d_ca_wo,
                              d_w1, d_w2, d_vec, g_vec, w_out, o_ref,
                              *, nhead, nlayers, d_model, d_hid,
                              s_src, s_tgt, bc):
    D, H = d_model, d_hid
    Dh = D // nhead
    scale = 1.0 / math.sqrt(Dh)
    EO, _ = _enc_vec_layout(D, H)
    DO, _ = _dec_vec_layout(D, H)
    GO, _ = _glb_vec_layout(D, OUT_PAD)

    def gv(name):
        off, ln = GO[name]
        return g_vec[0:1, off:off + ln]

    def ev(l, name):
        off, ln = EO[name]
        return e_vec[l:l + 1, off:off + ln]

    def dv(l, name):
        off, ln = DO[name]
        return d_vec[l:l + 1, off:off + ln]

    def mm(a, w):                       # bf16 MXU operands, f32 accumulate
        return jnp.dot(a.astype(jnp.bfloat16), w,
                       preferred_element_type=jnp.float32)

    def layernorm(x, g, b):             # f32 elementwise (eps = nn.Transformer)
        mean = jnp.mean(x, axis=-1, keepdims=True)
        c = x - mean
        var = jnp.mean(c * c, axis=-1, keepdims=True)
        return c * lax.rsqrt(var + 1e-5) * g + b

    def mha(q, k, v, wo, bo, mask):
        """q (Mq,D), k/v (Mk,D); heads sliced on the lane axis.  Per-head
        scores/PV, then ONE full-width (Mq,D)@(D,D) output projection."""
        qb = q.astype(jnp.bfloat16)
        kb = k.astype(jnp.bfloat16)
        vb = v.astype(jnp.bfloat16)
        outs = []
        for h in range(nhead):
            sl = slice(h * Dh, (h + 1) * Dh)
            s = lax.dot_general(qb[:, sl], kb[:, sl], (((1,), (1,)), ((), ())),
                                preferred_element_type=jnp.float32) * scale
            if mask is not None:
                s = s + mask
            s = s - jnp.max(s, axis=-1, keepdims=True)
            e = jnp.exp(s)
            # approx reciprocal (EUP slot); ~1e-2 rel. deviation from exact div
            p = e * pl.reciprocal(jnp.sum(e, axis=-1, keepdims=True), approx=True)
            outs.append(jnp.dot(p.astype(jnp.bfloat16), vb[:, sl],
                                preferred_element_type=jnp.float32))
        o = jnp.concatenate(outs, axis=-1)          # (Mq, D)
        return mm(o, wo) + bo

    def ffn(x, w1, b1, w2, b2):
        h = mm(x, w1) + b1
        h = jnp.maximum(h, 0.0)                     # ReLU (nn.Transformer default)
        return mm(h, w2) + b2

    M_src = bc * s_src
    M_tgt = bc * s_tgt

    # ---- masks built once in-kernel and hoisted above the layer loops --------
    r = lax.broadcasted_iota(jnp.int32, (M_tgt, M_tgt), 0)
    c = lax.broadcasted_iota(jnp.int32, (M_tgt, M_tgt), 1)
    ok = (c % s_tgt) <= (r % s_tgt)                 # causal within each batch
    if bc > 1:
        ok = ok & ((r // s_tgt) == (c // s_tgt))    # block-diagonal over batch
    dec_mask = jnp.where(ok, 0.0, -1e30).astype(jnp.float32)

    if bc > 1:
        rb = lax.broadcasted_iota(jnp.int32, (M_src, M_src), 0) // s_src
        cb = lax.broadcasted_iota(jnp.int32, (M_src, M_src), 1) // s_src
        enc_mask = jnp.where(rb == cb, 0.0, -1e30).astype(jnp.float32)
        rb2 = lax.broadcasted_iota(jnp.int32, (M_tgt, M_src), 0) // s_tgt
        cb2 = lax.broadcasted_iota(jnp.int32, (M_tgt, M_src), 1) // s_src
        cross_mask = jnp.where(rb2 == cb2, 0.0, -1e30).astype(jnp.float32)
    else:
        enc_mask = None
        cross_mask = None

    # ---- input embeddings + positional encoding (dropout = identity) ---------
    x = mm(src_ref[...], w_src[...]) + gv('b_src') + pe_src_ref[...]   # (M_src, D)
    y = tgt_ref[...] * gv('w_tgt') + gv('b_tgt') + pe_tgt_ref[...]     # (M_tgt, D)

    # -------------------------------- encoder stack ---------------------------
    for l in range(nlayers):
        qkv = mm(x, e_wqkv[l]) + ev(l, 'bqkv')
        a = mha(qkv[:, :D], qkv[:, D:2 * D], qkv[:, 2 * D:],
                e_wo[l], ev(l, 'bo'), enc_mask)
        x = layernorm(x + a, ev(l, 'ln1_g'), ev(l, 'ln1_b'))
        f = ffn(x, e_w1[l], ev(l, 'b1'), e_w2[l], ev(l, 'b2'))
        x = layernorm(x + f, ev(l, 'ln2_g'), ev(l, 'ln2_b'))
    mem = layernorm(x, gv('en_g'), gv('en_b'))

    # -------------------------------- decoder stack ---------------------------
    for l in range(nlayers):
        qkv = mm(y, d_sa_wqkv[l]) + dv(l, 'sa_bqkv')
        a = mha(qkv[:, :D], qkv[:, D:2 * D], qkv[:, 2 * D:],
                d_sa_wo[l], dv(l, 'sa_bo'), dec_mask)
        y = layernorm(y + a, dv(l, 'ln1_g'), dv(l, 'ln1_b'))

        q = mm(y, d_ca_wq[l]) + dv(l, 'ca_bq')
        kv = mm(mem, d_ca_wkv[l]) + dv(l, 'ca_bkv')
        cattn = mha(q, kv[:, :D], kv[:, D:],
                    d_ca_wo[l], dv(l, 'ca_bo'), cross_mask)
        y = layernorm(y + cattn, dv(l, 'ln2_g'), dv(l, 'ln2_b'))

        f = ffn(y, d_w1[l], dv(l, 'b1'), d_w2[l], dv(l, 'b2'))
        y = layernorm(y + f, dv(l, 'ln3_g'), dv(l, 'ln3_b'))
    y = layernorm(y, gv('dn_g'), gv('dn_b'))

    # ------------- output projection (zero-padded, lane-dense store) ----------
    o_ref[...] = (mm(y, w_out[...]) + gv('b_out')).astype(o_ref.dtype)


def transformer_qr_forward(src, tgt, p, *, nhead, d_model, d_hid, nlayers,
                           nquantiles, num_chunks=1):
    """num_chunks=1: whole batch folded into M (best on v5e/v6e, single TC).
    num_chunks=2: two parallel grid steps to feed both v7x TensorCores."""
    if src.ndim == 2:
        src = src[..., None]
    if tgt.ndim == 2:
        tgt = tgt[..., None]
    B, S_src, NF = src.shape
    S_tgt = tgt.shape[1]
    assert B % num_chunks == 0
    BC = B // num_chunks

    bf = lambda a: a.astype(jnp.bfloat16)

    # batch folded into the matmul M dimension
    src2d = src.reshape(B * S_src, NF).astype(jnp.float32)
    tgt2d = tgt.reshape(B * S_tgt, 1).astype(jnp.float32)
    pe_src_c = jnp.tile(p['pe'][:S_src], (BC, 1))        # per-chunk PE slab
    pe_tgt_c = jnp.tile(p['pe'][:S_tgt], (BC, 1))

    # pack the ~30 tiny vector params into 3 slabs (order must match *_layout)
    e_vec = jnp.concatenate([p['e_bqkv'], p['e_bo'], p['e_b1'], p['e_b2'],
                             p['e_ln1_g'], p['e_ln1_b'],
                             p['e_ln2_g'], p['e_ln2_b']], axis=1)
    d_vec = jnp.concatenate([p['d_sa_bqkv'], p['d_sa_bo'], p['d_ca_bq'],
                             p['d_ca_bkv'], p['d_ca_bo'], p['d_b1'], p['d_b2'],
                             p['d_ln1_g'], p['d_ln1_b'], p['d_ln2_g'],
                             p['d_ln2_b'], p['d_ln3_g'], p['d_ln3_b']], axis=1)
    g_vec = jnp.concatenate([p['b_src'], p['w_tgt'], p['b_tgt'],
                             p['en_g'], p['en_b'], p['dn_g'], p['dn_b'],
                             p['b_out']], axis=1)
    assert e_vec.shape[1] == _enc_vec_layout(d_model, d_hid)[1]
    assert d_vec.shape[1] == _dec_vec_layout(d_model, d_hid)[1]
    assert g_vec.shape[1] == _glb_vec_layout(d_model, OUT_PAD)[1]

    inputs = [
        src2d, tgt2d, pe_src_c, pe_tgt_c,
        bf(p['w_src']),
        bf(p['e_wqkv']), bf(p['e_wo']), bf(p['e_w1']), bf(p['e_w2']), e_vec,
        bf(p['d_sa_wqkv']), bf(p['d_sa_wo']), bf(p['d_ca_wq']),
        bf(p['d_ca_wkv']), bf(p['d_ca_wo']), bf(p['d_w1']), bf(p['d_w2']), d_vec,
        g_vec, bf(p['w_out']),
    ]

    def chunk_spec(shape, rows):        # per-chunk block along the folded-M axis
        nd = len(shape)
        return pl.BlockSpec((rows,) + tuple(shape[1:]),
                            lambda i, n=nd: (i,) + (0,) * (n - 1))

    def const_spec(shape):              # whole array, same block every step
        nd = len(shape)
        return pl.BlockSpec(tuple(shape), lambda i, n=nd: (0,) * n)

    in_specs = [chunk_spec(src2d.shape, BC * S_src),
                chunk_spec(tgt2d.shape, BC * S_tgt)]
    in_specs += [const_spec(a.shape) for a in inputs[2:]]

    kernel = functools.partial(_fused_transformer_kernel,
                               nhead=nhead, nlayers=nlayers, d_model=d_model,
                               d_hid=d_hid, s_src=S_src, s_tgt=S_tgt, bc=BC)

    out = pl.pallas_call(
        kernel,
        out_shape=jax.ShapeDtypeStruct((B * S_tgt, OUT_PAD), jnp.float32),
        grid=(num_chunks,),
        in_specs=in_specs,
        out_specs=chunk_spec((B * S_tgt, OUT_PAD), BC * S_tgt),
        compiler_params=pltpu.CompilerParams(dimension_semantics=("parallel",)),
    )(*inputs)
    return out.reshape(B, S_tgt, OUT_PAD)[:, :, :nquantiles]


# ------------------------------ params / init ---------------------------------

def init_params(key, *, nhead, d_model, d_hid, nlayers, max_len, nfeatures,
                nquantiles):
    keys = iter(jax.random.split(key, 1024))
    D, H = d_model, d_hid

    def uniform(shape, lim):
        return jax.random.uniform(next(keys), shape, jnp.float32, -lim, lim)

    def xavier(shape):
        lim = math.sqrt(6.0 / (shape[0] + shape[1]))
        return uniform(shape, lim)

    def stack(make):
        return jnp.stack([make() for _ in range(nlayers)])

    def qkv_w():   # packed (D, 3D) in-projection
        return jnp.concatenate([xavier((D, D)) for _ in range(3)], axis=1)

    def kv_w():    # packed (D, 2D) K/V projection for cross-attention
        return jnp.concatenate([xavier((D, D)) for _ in range(2)], axis=1)

    zeros = lambda s: jnp.zeros(s, jnp.float32)
    ones = lambda s: jnp.ones(s, jnp.float32)

    params = dict(
        w_src=uniform((nfeatures, D), 0.1), b_src=zeros((1, D)),
        w_tgt=uniform((1, D), 0.1),         b_tgt=zeros((1, D)),
        # encoder stack (stacked over layers)
        e_wqkv=stack(qkv_w), e_bqkv=zeros((nlayers, 3 * D)),
        e_wo=stack(lambda: xavier((D, D))), e_bo=zeros((nlayers, D)),
        e_w1=stack(lambda: xavier((D, H))), e_b1=zeros((nlayers, H)),
        e_w2=stack(lambda: xavier((H, D))), e_b2=zeros((nlayers, D)),
        e_ln1_g=ones((nlayers, D)), e_ln1_b=zeros((nlayers, D)),
        e_ln2_g=ones((nlayers, D)), e_ln2_b=zeros((nlayers, D)),
        en_g=ones((1, D)), en_b=zeros((1, D)),
        # decoder stack
        d_sa_wqkv=stack(qkv_w), d_sa_bqkv=zeros((nlayers, 3 * D)),
        d_sa_wo=stack(lambda: xavier((D, D))), d_sa_bo=zeros((nlayers, D)),
        d_ca_wq=stack(lambda: xavier((D, D))), d_ca_bq=zeros((nlayers, D)),
        d_ca_wkv=stack(kv_w), d_ca_bkv=zeros((nlayers, 2 * D)),
        d_ca_wo=stack(lambda: xavier((D, D))), d_ca_bo=zeros((nlayers, D)),
        d_w1=stack(lambda: xavier((D, H))), d_b1=zeros((nlayers, H)),
        d_w2=stack(lambda: xavier((H, D))), d_b2=zeros((nlayers, D)),
        d_ln1_g=ones((nlayers, D)), d_ln1_b=zeros((nlayers, D)),
        d_ln2_g=ones((nlayers, D)), d_ln2_b=zeros((nlayers, D)),
        d_ln3_g=ones((nlayers, D)), d_ln3_b=zeros((nlayers, D)),
        dn_g=ones((1, D)), dn_b=zeros((1, D)),
    )

    # final projection, zero-padded to a lane-dense 128-wide output
    w_dec = uniform((D, nquantiles), 0.1)
    params['w_out'] = zeros((D, OUT_PAD)).at[:, :nquantiles].set(w_dec)
    params['b_out'] = zeros((1, OUT_PAD))

    # PositionalEncoding buffer, same formula as the PyTorch module
    position = jnp.arange(max_len, dtype=jnp.float32)[:, None]
    div_term = jnp.exp(jnp.arange(0, d_model, 2, dtype=jnp.float32)
                       * (-math.log(10000.0) / d_model))
    pe = jnp.zeros((max_len, d_model), jnp.float32)
    pe = pe.at[:, 0::2].set(jnp.sin(position * div_term))
    pe = pe.at[:, 1::2].set(jnp.cos(position * div_term))
    params['pe'] = pe                     # (max_len, d_model)
    return params


# ---------------------------------- main ---------------------------------------

if __name__ == "__main__":
    nhead, d_model, d_hid, nlayers = 4, 32, 64, 2
    input_len, target_len, nfeatures, nquantiles = 16, 8, 4, 3
    batch = 2

    key = jax.random.PRNGKey(0)
    pkey, skey, tkey, xkey = jax.random.split(key, 4)

    params = init_params(pkey, nhead=nhead, d_model=d_model, d_hid=d_hid,
                         nlayers=nlayers, max_len=max(input_len, target_len),
                         nfeatures=nfeatures, nquantiles=nquantiles)

    # --- 1) standalone PositionalEncoding kernel (the spec module) ---
    x_pe = jax.random.normal(xkey, (batch, input_len, d_model), jnp.float32)
    pe_out = jax.block_until_ready(positional_encoding(x_pe, params['pe']))
    pe_ref = x_pe + params['pe'][:input_len][None, :, :]
    assert pe_out.shape == (batch, input_len, d_model), pe_out.shape
    assert bool(jnp.allclose(pe_out, pe_ref, rtol=1e-6, atol=1e-6))

    # --- 2) fully fused transformer QR forward (batch folded into M) ---
    src = jax.random.normal(skey, (batch, input_len, nfeatures), jnp.float32)
    tgt = jax.random.normal(tkey, (batch, target_len), jnp.float32)

    out = transformer_qr_forward(src, tgt, params, nhead=nhead, d_model=d_model,
                                 d_hid=d_hid, nlayers=nlayers,
                                 nquantiles=nquantiles, num_chunks=1)
    out = jax.block_until_ready(out)

    assert out.shape == (batch, target_len, nquantiles), out.shape
    assert bool(jnp.all(jnp.isfinite(out)))
    print("KERNEL_OK")
</pallas_src>

<mosaic_0001>
module attributes {stable_mosaic.version = 11 : i64} {
  func.func @_pe_kernel(%arg0: i32, %arg1: i32, %arg2: memref<1x4x128xf32, #tpu.memory_space<vmem>>, %arg3: memref<1x4x128xf32, #tpu.memory_space<vmem>>, %arg4: memref<1x4x128xf32, #tpu.memory_space<vmem>>) attributes {dimension_semantics = [#tpu.dimension_semantics<parallel>, #tpu.dimension_semantics<parallel>], iteration_bounds = array<i64: 2, 1>, scalar_prefetch = 0 : i64, scratch_operands = 0 : i64, tpu.core_type = #tpu.core_type<tc>, window_params = [{transform_indices = @transform_0, window_bounds = array<i64: 1, 4, 128>}, {transform_indices = @transform_1, window_bounds = array<i64: 1, 4, 128>}, {transform_indices = @transform_2, window_bounds = array<i64: 1, 4, 128>}]} {
    %c0 = arith.constant 0 : index
    %c0_0 = arith.constant 0 : index
    %c0_1 = arith.constant 0 : index
    %0 = vector.load %arg2[%c0, %c0_0, %c0_1] : memref<1x4x128xf32, #tpu.memory_space<vmem>>, vector<1x4x128xf32>
    %c0_2 = arith.constant 0 : index
    %c0_3 = arith.constant 0 : index
    %c0_4 = arith.constant 0 : index
    %1 = vector.load %arg3[%c0_2, %c0_3, %c0_4] : memref<1x4x128xf32, #tpu.memory_space<vmem>>, vector<1x4x128xf32>
    %2 = arith.addf %0, %1 : vector<1x4x128xf32>
    %c0_5 = arith.constant 0 : index
    %c0_6 = arith.constant 0 : index
    %c0_7 = arith.constant 0 : index
    %3 = vector.load %arg4[%c0_5, %c0_6, %c0_7] : memref<1x4x128xf32, #tpu.memory_space<vmem>>, vector<1x4x128xf32>
    tpu.vector_store %arg4[%c0_5, %c0_6, %c0_7], %2 {strides = array<i32>} : memref<1x4x128xf32, #tpu.memory_space<vmem>>, vector<1x4x128xf32>,
    return
  }
  func.func @transform_0(%arg0: i32, %arg1: i32) -> (i32, i32, i32) {
    %c0_i32 = arith.constant 0 : i32
    %c0_i32_0 = arith.constant 0 : i32
    return %arg0, %arg1, %c0_i32 : i32, i32, i32
  }
  func.func @transform_1(%arg0: i32, %arg1: i32) -> (i32, i32, i32) {
    %c0_i32 = arith.constant 0 : i32
    %c0_i32_0 = arith.constant 0 : i32
    %c0_i32_1 = arith.constant 0 : i32
    return %c0_i32, %arg1, %c0_i32_0 : i32, i32, i32
  }
  func.func @transform_2(%arg0: i32, %arg1: i32) -> (i32, i32, i32) {
    %c0_i32 = arith.constant 0 : i32
    %c0_i32_0 = arith.constant 0 : i32
    return %arg0, %arg1, %c0_i32 : i32, i32, i32
  }
}

</mosaic_0001>

<bundles_post_ra>
// kernel: tpu_custom_call.1
= control target key start
LH: loop header
LB: loop body
LE: loop exit
PB: predicated region body
PF: predicated region fallthrough
CT: control target
= control target key end

     0   :  { %7 = vsyncpa [#allocation3], 0  ;;  %s714_s0 = inlined_call_operand.hbm [shape: f32[2,4,128], index: 0, kind: input, shape index: {}]   ;;  %s715_s1 = inlined_call_operand.hbm [shape: f32[1,4,128], index: 1, kind: input, shape index: {}]   ;;  %s716_s2 = inlined_call_operand.hbm [shape: f32[2,4,128], index: 2, kind: output, shape index: {}]  }
   0x1   :  { %9 = vsyncpa [#allocation3 + $0x1], 0 }
   0x2   :  { %10 = vsyncpa [#allocation6], 0 }
   0x3   :  { %11 = vsyncpa [#allocation4], 0 }
   0x4   :  { %13 = vsyncpa [#allocation4 + $0x1], 0  ;;  %s565_s9 = smov 0   ;;  %s567_s10 = smov 0  }
   0x5   :  { %s569_s11 = smov 0   ;;  %s571_s12 = smov 0  }
   0x6   :  { %s573_s13 = smov 0   ;;  %s575_s14 = smov 0  }
   0x7 LB: > { %s313_s15 = sadd.s32 4294967295, %s547_s14   ;;  %s314_s16 = sadd.s32 4294967294, %s547_s14   ;;  %s547_s14 = sphi %s575_s14, %s19_s14   ;;  %s543_s13 = sphi %s573_s13, %s728_s13   ;;  %s539_s12 = sphi %s571_s12, %s727_s12   ;;  %s535_s11 = sphi %s569_s11, %s726_s11   ;;  %s531_s10 = sphi %s567_s10, %s725_s10   ;;  %s527_s9 = sphi %s565_s9, %s724_s9  }
   0x8   : > { %p53_p0 = scmp.ne.s32.totalorder %s531_s10, %s527_s9  ;;  %p599_p1 = scmp.eq.s32.totalorder %s313_s15, 0 }
   0x9   : > { %p603_p2 = scmp.eq.s32.totalorder %s313_s15, 1  ;;  %p111_p3 = scmp.eq.s32.totalorder %s314_s16, 1 }
   0xa   : > { %p609_p4 = por %p599_p1, %p53_p0  ;;  %p315_p5 = scmp.ge.s32.totalorder %s547_s14, 1 }
   0xb   : > { %p614_p6 = por %p111_p3, %p53_p0  ;;  %p118_p7 = scmp.lt.s32.totalorder %s547_s14, 3 }
   0xc   : > { %s132_s23 = sshll.u32 %s715_s1, 4  ;;  %p317_p9 = scmp.ge.s32.totalorder %s547_s14, 2  ;;  %s133_s23 = int_to_ptr.hbm [resolvable:$true] %s132_s23 }
   0xd   : > { %p622_p8 = pnand %p315_p5, %p118_p7  ;;  %s549_s25 = smov [#allocation5]  }
   0xe   : > { %s134_s26 = sshll.u32 %s549_s25, 4  ;;  %s31_s27 = sadd.s32 1, %s543_s13  ;;  %s135_s26 = int_to_ptr.vmem [resolvable:$true] %s134_s26 }
   0xf   : > { %p336_p10 = pneg %p622_p8  ;;  %p33_p12 = scmp.ge.s32.totalorder %s31_s27, 2 }
  0x10   : > { %s40_s28 = sadd.s32 1, %s535_s11  ;;  %p47_p13 = scmp.ne.s32.totalorder %s535_s11, %s531_s10 }
  0x11   : > { %p337_p11 = pnand %p336_p10, %p599_p1  ;;  %p48_p0 = scmp.eq.s32.totalorder %s547_s14, 0 }
  0x12   : > { %s730_s27 = smov (%p33_p12, %s31_s27), 0  ;;  %p644_p5 = por %p603_p2, %p47_p13 }
  0x13   : > { %339 = dma.hbm_to_vmem [thread:$0]  (!%p337_p11), %s133_s23, 64, %s135_s26, [#allocation6]  }
  0x14   : > { %p638_p3 = por %p48_p0, %p47_p13  ;;  %s35_s3 = ssub.s32 %s543_s13, %s730_s27 }
  0x15   : > { %p349_p7 = scmp.lt.s32.totalorder %s547_s14, 2  ;;  %p38_p10 = scmp.eq.s32.totalorder %s35_s3, 0 }
  0x16   : > { %s145_s4 = sand.u32 1, %s535_s11   ;;  %s319_s7 = sshll.u32 %s543_s13, 2 }
  0x17   : > { %s318_s5 = sshll.u32 %s145_s4, 2  ;;  %s154_s16 = scalar_lea.hbm %s714_s0, %s319_s7 }
  0x18   : > { %s653_s6 = scalar_select %p38_p10, %s535_s11, %s40_s28  }
  0x19   : > { %s149_s21 = scalar_lea.vmem [#allocation2], %s318_s5  ;;  %s156_s18 = sshll.u32 %s154_s16, 4  ;;  %s157_s18 = int_to_ptr.hbm [resolvable:$true] %s156_s18 }
  0x1a   : > { %s158_s22 = sshll.u32 %s149_s21, 4  ;;  %p341_p2 = pnand %p349_p7, %p638_p3  ;;  %s159_s22 = int_to_ptr.vmem [resolvable:$true] %s158_s22 }
  0x1b   : > { %s146_s23 = scalar_lea.sflag [#allocation3], %s145_s4  ;;  %167 = sbr.rel (%p622_p8) target bundleno = 50 (0x32), region = 28 }
  0x1c   : > { %343 = dma.hbm_to_vmem [thread:$0]  (!%p341_p2), %s157_s18, 64, %s159_s22, %s146_s23  }
  0x1d   : > { %s664_s25 = sand.u32 (!%p622_p8), 1, %s531_s10  }
  0x1e   : > { %s321_s26 = sshll.u32 (!%p622_p8), %s664_s25, 2  ;;  %s170_s28 = scalar_lea.sflag (!%p622_p8), [#allocation3], %s664_s25 }
  0x1f   : > { %s173_s3 = scalar_lea.vmem (!%p622_p8), [#allocation2], %s321_s26 }
  0x20   : > { %514 = dma.done.wait (%p609_p4), %s170_s28, 64  }
  0x21   : > { %516 = vsyncadd (%p609_p4), %s170_s28, 4294967232 }
  0x22   : > { %518 = dma.done.wait (%p599_p1), [#allocation6], 64  }
  0x23   : > { %520 = vsyncadd (%p599_p1), [#allocation6], 4294967232  ;;  %s325_s24 = sshll.u32 %s539_s12, 2  ;;  %s199_s7 = scalar_lea.vmem [#allocation7], %s321_s26  ;;  %v200_v0 = vld [vmem:[%s173_s3] sm:$0xf] }
  0x24   : > { %s216_s5 = scalar_lea.hbm %s716_s2, %s325_s24  ;;  %s218_s8 = sshll.u32 %s199_s7, 4  ;;  %v201_v1 = vld [vmem:[#allocation5] sm:$0xf]  ;;  %s219_s8 = int_to_ptr.vmem [resolvable:$true] %s218_s8 }
  0x25   : > { %s220_s15 = sshll.u32 %s216_s5, 4  ;;  %v202_v2 = vadd.f32 %v201_v1, %v200_v0  ;;  %s205_s19 = scalar_lea.sflag [#allocation4], %s664_s25  ;;  %s221_s15 = int_to_ptr.hbm [resolvable:$true] %s220_s15 }
  0x26   : > { %s475_s17 = sshra.s32 %s221_s15, 4  ;;  %s481_s22 = scalar_lea.hbm %s716_s2, 8  ;;  %s476_s17 = int_to_ptr.hbm [resolvable:$true] %s475_s17 }
  0x27   : > { %203 = vst [vmem:[%s199_s7] sm:$0xf] %v202_v2  ;;  %s477_s16 = scalar_lea.hbm %s476_s17, 4  ;;  %p482_p11 = scmp.lt.s32.totalorder %s476_s17, %s716_s2 }
  0x28   : > { %p478_p1 = scmp.ne.s32.totalorder %s476_s17, %s477_s16  ;;  %p483_p12 = scmp.lt.s32.totalorder %s481_s22, %s477_s16 }
  0x2a   : > { %p479_p4 = pnand %p478_p1, %p644_p5  ;;  %p484_p13 = por %p483_p12, %p482_p11 }
  0x2c   : > { %p480_p8 = pneg %p479_p4 }
  0x2e   : > { %p485_p0 = pnand %p484_p13, %p480_p8 }
  0x30   : > { %488 = shalt.err (!%p485_p0)
}
  0x31   : > { %334 = dma.vmem_to_hbm [thread:$0]  (%p644_p5), %s219_s8, 64, %s221_s15, %s205_s19  }
  0x32 PF: > { %s232_s25 = sand.u32 1, %s527_s9   ;;  %p345_p3 = pnand %p317_p9, %p614_p6 }
  0x33   : > { %s233_s26 = scalar_lea.sflag [#allocation4], %s232_s25 }
  0x34   : > { %p346_p7 = pneg %p345_p3 }
  0x36   : > { %522 = dma.done.wait (%p346_p7), %s233_s26, 64  }
  0x37   : > { %524 = vsyncadd (%p346_p7), %s233_s26, 4294967232  ;;  %s19_s14 = sadd.s32 1, %s547_s14   ;;  %s724_s9 = smov %s531_s10 }
  0x38   : > { %p16_p10 = scmp.ge.s32.totalorder %s19_s14, 4   ;;  %s725_s10 = smov %s535_s11 }
  0x39   : > { %s726_s11 = smov %s653_s6  ;;  %s727_s12 = smov %s543_s13 }
  0x3a   : > { %s728_s13 = smov %s730_s27  ;;  %18 = sbr.rel (!%p16_p10) target bundleno = 7 (0x7), region = 78 }
  0x3f   :  { %239 = vsyncpa [#allocation3], 1 }
  0x40   :  { %241 = vsyncpa [#allocation3 + $0x1], 1 }
  0x41   :  { %242 = vsyncpa [#allocation6], 1 }
  0x42   :  { %243 = vsyncpa [#allocation4], 1 }
  0x43   :  { %245 = vsyncpa [#allocation4 + $0x1], 1 }

</bundles_post_ra>
